<compile_context>
chip_gen: v7x
topology: tpu7x:2x2x1
jax: 0.10.0
libtpu: 0.0.40
codegen_flags: <defaults>
</compile_context>

<pallas_src>
import math
import jax
import jax.numpy as jnp
from jax.experimental import pallas as pl
from jax.experimental.pallas import tpu as pltpu


# freq='h': x_mark columns are [month, day, weekday, hour] with these vocab sizes.
_FEATURE_SIZES = (13, 32, 7, 24)


def _sinusoid_table(n, d_model):
    """FixedEmbedding / PositionalEmbedding sinusoid table (same formula as PyTorch)."""
    assert d_model % 2 == 0, "FixedEmbedding assumes an even d_model"
    pos = jnp.arange(n, dtype=jnp.float32)[:, None]
    div = jnp.exp(jnp.arange(0, d_model, 2, dtype=jnp.float32)
                  * (-math.log(10000.0) / d_model))
    tab = jnp.zeros((n, d_model), jnp.float32)
    tab = tab.at[:, 0::2].set(jnp.sin(pos * div))
    tab = tab.at[:, 1::2].set(jnp.cos(pos * div))
    return tab


def _round_up(x, m):
    return ((x + m - 1) // m) * m


def _build_temporal_table(d_model):
    """Concatenated, sublane-padded fixed tables + per-feature row offsets."""
    rows, offsets, off = [], [], 0
    for size in _FEATURE_SIZES:
        pad = _round_up(size, 8)
        tab = _sinusoid_table(size, d_model)
        rows.append(jnp.pad(tab, ((0, pad - size), (0, 0))))
        offsets.append(off)
        off += pad
    return jnp.concatenate(rows, axis=0), tuple(offsets)   # ((80, d_model), (0,16,48,56))


def _vmem_capacity_bytes():
    """Physical VMEM per TensorCore; conservative v7x (64 MiB) fallback on failure."""
    try:
        info = pltpu.get_tpu_info()
        for attr in ("vmem_capacity_bytes", "vmem_bytes", "vmem_size_bytes"):
            val = getattr(info, attr, None)
            if val:
                return int(val)
    except Exception:
        pass
    return 64 << 20


def _pick_tile_rows(total_rows, c_in, d_model, tab_rows, *, in_bytes, out_bytes,
                    row_align, vmem_budget_bytes, tm_cap=4096, min_steps=8):
    """Largest row tile within the VMEM budget, keeping >= min_steps grid steps and
    preferring a tile that divides total_rows exactly (no wrapper-side pad copy)."""
    per_row = (2 * 3 * c_in * in_bytes        # double-buffered x3 block
               + 2 * 4 * 4                    # double-buffered idx block (int32)
               + 2 * d_model * out_bytes      # double-buffered output block
               + d_model * 4                  # f32 accumulator temp
               + 2 * tab_rows * 4)            # iota + multi-hot temps
    tm = max(row_align, vmem_budget_bytes // per_row)
    tm = min(tm, tm_cap, _round_up(total_rows, row_align))
    if total_rows >= min_steps * row_align:   # >= 8 steps -> >= 4/TC on v7x megacore
        tm = min(tm, _round_up(-(-total_rows // min_steps), row_align))
    tm = max(row_align, (tm // row_align) * row_align)
    if total_rows % tm != 0:                  # try to avoid the whole-array pad copy
        for cand in range(tm, row_align - 1, -row_align):
            if total_rows % cand == 0:
                if cand * 4 >= tm:            # accept at most a 4x shrink
                    tm = cand
                break
    return tm


def _embedding_kernel(x3_ref, idx_ref, w_ref, tab_ref, o_ref):
    rows = x3_ref.shape[0]
    vocab = tab_ref.shape[0]
    # Value embedding: circular k=3 conv folded into one (tm, 3*c_in) @ (3*c_in, d_model).
    acc = jnp.dot(x3_ref[...], w_ref[...], preferred_element_type=jnp.float32)
    # Temporal embedding: single multi-hot (tm, 80) @ (80, d_model).  The per-feature
    # ranges in the concatenated table are disjoint, so OR-ing the equality masks gives
    # exactly the sum of the 4 one-hot lookups.  One iota per tile (no per-feature
    # broadcast_in_dim in a loop).
    idx = idx_ref[...]                                            # (tm, 4) int32, pre-offset
    iota = jax.lax.broadcasted_iota(jnp.int32, (rows, vocab), 1)
    hit = iota == idx[:, 0:1]
    for f in range(1, idx.shape[1]):                              # static unroll (3 ORs)
        hit = hit | (iota == idx[:, f:f + 1])
    acc = acc + jnp.dot(hit.astype(tab_ref.dtype), tab_ref[...],
                        preferred_element_type=jnp.float32)
    # Dropout(p=0.1) is identity in eval mode.
    o_ref[...] = acc.astype(o_ref.dtype)


def data_embedding_wo_pos(x, x_mark, conv_w, *, tile_rows=None,
                          compute_dtype=jnp.float32, out_dtype=jnp.float32):
    """DataEmbedding_wo_pos forward (embed_type='fixed', freq='h', eval mode).

    x:      (B, L, c_in) float
    x_mark: (B, L, 4) int, columns [month, day, weekday, hour]
    conv_w: (d_model, c_in, 3) Conv1d weight (circular padding, no bias)

    compute_dtype=jnp.bfloat16 is the recommended production setting on v5e/v6e/v7x
    (half the x3 HBM bytes, bf16-native MXU, f32 accumulation kept); the default stays
    f32 for exact parity with the PyTorch module.  out_dtype=jnp.bfloat16 additionally
    halves the dominant output HBM stream when the consumer accepts it.
    """
    B, L, c_in = x.shape
    d_model = conv_w.shape[0]
    BL = B * L

    # Circular k=3 conv folded into one matmul: concat the +/-1 shifted copies on features.
    # TODO(synk): for very wide c_in (e.g. Traffic c_in=862) this 3x-wide x3 copy becomes
    # the dominant HBM stream; a manual per-tile halo DMA would avoid materializing it.
    x = x.astype(compute_dtype)
    x3 = jnp.concatenate([jnp.roll(x, 1, axis=1), x, jnp.roll(x, -1, axis=1)],
                         axis=-1).reshape(BL, 3 * c_in)
    # (d_model, c_in, 3) -> (3, c_in, d_model) -> (3*c_in, d_model), tap-major rows.
    w_fused = jnp.transpose(conv_w, (2, 1, 0)).reshape(3 * c_in, d_model)
    w_fused = w_fused.astype(compute_dtype)

    # Fixed temporal tables (concatenated, sublane-padded); indices are clamped to their
    # vocab (PyTorch nn.Embedding would raise on OOB) and pre-offset into the big table.
    tab, offsets = _build_temporal_table(d_model)
    tab = tab.astype(compute_dtype)
    idx = jnp.stack(
        [jnp.clip(x_mark[..., f].astype(jnp.int32), 0, size - 1) + off
         for f, (size, off) in enumerate(zip(_FEATURE_SIZES, offsets))],
        axis=-1).reshape(BL, 4)

    in_bytes = jnp.dtype(compute_dtype).itemsize
    out_bytes = jnp.dtype(out_dtype).itemsize
    row_align = 16 if min(in_bytes, out_bytes) < 4 else 8     # bf16 packs 2 rows/sublane
    vmem_cap = _vmem_capacity_bytes()
    tm = tile_rows if tile_rows is not None else _pick_tile_rows(
        BL, c_in, d_model, tab.shape[0], in_bytes=in_bytes, out_bytes=out_bytes,
        row_align=row_align, vmem_budget_bytes=vmem_cap // 4)

    # Pad rows only when no suitable exact-divisor tile exists (pad rewrites x3 in HBM).
    blp = _round_up(max(BL, tm), tm)
    if blp != BL:
        x3 = jnp.pad(x3, ((0, blp - BL), (0, 0)))
        idx = jnp.pad(idx, ((0, blp - BL), (0, 0)), constant_values=-1)  # matches nothing

    # Raise the scoped VMEM limit only when the working set (double-buffered blocks +
    # constant operands + in-kernel f32 temporaries) actually needs it, staying well
    # below physical VMEM (64 MiB on v7x, 128 MiB on v5e/v6e).
    est_bytes = (2 * tm * 3 * c_in * in_bytes
                 + 2 * tm * 4 * 4
                 + 2 * tm * d_model * out_bytes
                 + 2 * (w_fused.size + tab.size) * in_bytes
                 + tm * d_model * 4
                 + 2 * tm * tab.shape[0] * 4)
    vmem_limit = None
    if est_bytes + est_bytes // 2 > (12 << 20):
        vmem_limit = int(min(vmem_cap - (16 << 20),
                             max(est_bytes + est_bytes // 2, 32 << 20)))

    # TODO(synk): on v7x, pipeline_mode=pl.Buffered(1) on the constant w_fused/tab specs
    # would drop their unused second buffer; left off until buffer_count=1 lowering is
    # verified on the deployed jax version.
    out = pl.pallas_call(
        _embedding_kernel,
        out_shape=jax.ShapeDtypeStruct((blp, d_model), out_dtype),
        grid_spec=pltpu.PrefetchScalarGridSpec(
            num_scalar_prefetch=0,
            grid=(blp // tm,),
            in_specs=[
                pl.BlockSpec((tm, 3 * c_in), lambda i: (i, 0)),
                pl.BlockSpec((tm, 4), lambda i: (i, 0)),
                pl.BlockSpec((3 * c_in, d_model), lambda i: (0, 0)),
                pl.BlockSpec(tab.shape, lambda i: (0, 0)),
            ],
            out_specs=pl.BlockSpec((tm, d_model), lambda i: (i, 0)),
        ),
        compiler_params=pltpu.CompilerParams(
            dimension_semantics=("parallel",),
            vmem_limit_bytes=vmem_limit,
        ),
    )(x3, idx, w_fused, tab)

    return out[:BL].reshape(B, L, d_model)


if __name__ == "__main__":
    B, L, c_in, d_model = 2, 8, 4, 32
    key = jax.random.PRNGKey(0)
    k1, k2, k3, k4, k5, k6 = jax.random.split(key, 6)

    x = jax.random.normal(k1, (B, L, c_in), jnp.float32)
    month = jax.random.randint(k2, (B, L), 0, 13)
    day = jax.random.randint(k3, (B, L), 0, 32)
    weekday = jax.random.randint(k4, (B, L), 0, 7)
    hour = jax.random.randint(k5, (B, L), 0, 24)
    x_mark = jnp.stack([month, day, weekday, hour], axis=-1).astype(jnp.int32)

    # TokenEmbedding Conv1d weight (d_model, c_in, 3), kaiming_normal(fan_in, leaky_relu)
    fan_in = c_in * 3
    std = math.sqrt(2.0) / math.sqrt(fan_in)
    conv_w = jax.random.normal(k6, (d_model, c_in, 3), jnp.float32) * std

    # pure-JAX reference (circular conv + fixed temporal embedding, dropout = identity)
    x_pad = jnp.concatenate([x[:, -1:], x, x[:, :1]], axis=1)     # (B, L+2, c_in)
    val_ref = jnp.zeros((B, L, d_model), jnp.float32)
    for k in range(3):
        val_ref += jnp.einsum("blc,cd->bld", x_pad[:, k:k + L], conv_w[:, :, k].T)
    tabs = [_sinusoid_table(s, d_model) for s in _FEATURE_SIZES]
    temp_ref = tabs[0][month] + tabs[1][day] + tabs[2][weekday] + tabs[3][hour]
    ref = val_ref + temp_ref

    # f32 path: exact parity with the PyTorch module.
    out = jax.block_until_ready(data_embedding_wo_pos(x, x_mark, conv_w))
    assert out.shape == (B, L, d_model)
    err = float(jnp.max(jnp.abs(out - ref)))
    assert jnp.allclose(out, ref, atol=1e-4, rtol=1e-4), err

    # bf16 compute + bf16 output (recommended production path): loose-tolerance check.
    out_bf16 = jax.block_until_ready(
        data_embedding_wo_pos(x, x_mark, conv_w,
                              compute_dtype=jnp.bfloat16, out_dtype=jnp.bfloat16))
    assert out_bf16.dtype == jnp.bfloat16
    err_bf16 = float(jnp.max(jnp.abs(out_bf16.astype(jnp.float32) - ref)))
    assert jnp.allclose(out_bf16.astype(jnp.float32), ref, atol=1e-1, rtol=1e-1), err_bf16

    print("KERNEL_OK")
</pallas_src>

<mosaic_0001>
module attributes {stable_mosaic.version = 11 : i64} {
  func.func @_embedding_kernel(%arg0: i32, %arg1: memref<16x12xf32, #tpu.memory_space<vmem>>, %arg2: memref<16x4xi32, #tpu.memory_space<vmem>>, %arg3: memref<12x32xf32, #tpu.memory_space<vmem>>, %arg4: memref<80x32xf32, #tpu.memory_space<vmem>>, %arg5: memref<16x32xf32, #tpu.memory_space<vmem>>) attributes {dimension_semantics = [#tpu.dimension_semantics<parallel>], iteration_bounds = array<i64: 1>, scalar_prefetch = 0 : i64, scratch_operands = 0 : i64, tpu.core_type = #tpu.core_type<tc>, window_params = [{transform_indices = @transform_0, window_bounds = array<i64: 16, 12>}, {transform_indices = @transform_1, window_bounds = array<i64: 16, 4>}, {pipeline_mode = #tpu.pipeline_mode<synchronous>, transform_indices = @transform_2, window_bounds = array<i64: 12, 32>}, {pipeline_mode = #tpu.pipeline_mode<synchronous>, transform_indices = @transform_3, window_bounds = array<i64: 80, 32>}, {transform_indices = @transform_4, window_bounds = array<i64: 16, 32>}]} {
    %c0 = arith.constant 0 : index
    %c0_0 = arith.constant 0 : index
    %0 = vector.load %arg1[%c0, %c0_0] : memref<16x12xf32, #tpu.memory_space<vmem>>, vector<16x12xf32>
    %c0_1 = arith.constant 0 : index
    %c0_2 = arith.constant 0 : index
    %1 = vector.load %arg3[%c0_1, %c0_2] : memref<12x32xf32, #tpu.memory_space<vmem>>, vector<12x32xf32>
    %cst = arith.constant dense<0.000000e+00> : vector<16x32xf32>
    %2 = tpu.matmul %0, %1, %cst {dimension_numbers = #tpu.dot_dimension_numbers<[1], [0], [0], [1], [0, 0, 1, 1], [], []>} : vector<16x12xf32>, vector<12x32xf32>, vector<16x32xf32> -> vector<16x32xf32>
    %c0_3 = arith.constant 0 : index
    %c0_4 = arith.constant 0 : index
    %3 = vector.load %arg2[%c0_3, %c0_4] : memref<16x4xi32, #tpu.memory_space<vmem>>, vector<16x4xi32>
    %4 = tpu.iota {dimensions = array<i32: 1>} : vector<16x80xi32>
    %5 = vector.extract_strided_slice %3 {offsets = [0, 0], sizes = [16, 1], strides = [1, 1]} : vector<16x4xi32> to vector<16x1xi32>
    %6 = vector.broadcast %5 : vector<16x1xi32> to vector<16x80xi32>
    %7 = arith.cmpi eq, %4, %6 : vector<16x80xi32>
    %8 = vector.extract_strided_slice %3 {offsets = [0, 1], sizes = [16, 1], strides = [1, 1]} : vector<16x4xi32> to vector<16x1xi32>
    %9 = vector.broadcast %8 : vector<16x1xi32> to vector<16x80xi32>
    %10 = arith.cmpi eq, %4, %9 : vector<16x80xi32>
    %11 = arith.ori %7, %10 : vector<16x80xi1>
    %12 = vector.extract_strided_slice %3 {offsets = [0, 2], sizes = [16, 1], strides = [1, 1]} : vector<16x4xi32> to vector<16x1xi32>
    %13 = vector.broadcast %12 : vector<16x1xi32> to vector<16x80xi32>
    %14 = arith.cmpi eq, %4, %13 : vector<16x80xi32>
    %15 = arith.ori %11, %14 : vector<16x80xi1>
    %16 = vector.extract_strided_slice %3 {offsets = [0, 3], sizes = [16, 1], strides = [1, 1]} : vector<16x4xi32> to vector<16x1xi32>
    %17 = vector.broadcast %16 : vector<16x1xi32> to vector<16x80xi32>
    %18 = arith.cmpi eq, %4, %17 : vector<16x80xi32>
    %19 = arith.ori %15, %18 : vector<16x80xi1>
    %20 = arith.extui %19 : vector<16x80xi1> to vector<16x80xi32>
    %21 = arith.sitofp %20 : vector<16x80xi32> to vector<16x80xf32>
    %c0_5 = arith.constant 0 : index
    %c0_6 = arith.constant 0 : index
    %22 = vector.load %arg4[%c0_5, %c0_6] : memref<80x32xf32, #tpu.memory_space<vmem>>, vector<80x32xf32>
    %cst_7 = arith.constant dense<0.000000e+00> : vector<16x32xf32>
    %23 = tpu.matmul %21, %22, %cst_7 {dimension_numbers = #tpu.dot_dimension_numbers<[1], [0], [0], [1], [0, 0, 1, 1], [], []>} : vector<16x80xf32>, vector<80x32xf32>, vector<16x32xf32> -> vector<16x32xf32>
    %24 = arith.addf %2, %23 : vector<16x32xf32>
    %c0_8 = arith.constant 0 : index
    %c0_9 = arith.constant 0 : index
    %25 = vector.load %arg5[%c0_8, %c0_9] : memref<16x32xf32, #tpu.memory_space<vmem>>, vector<16x32xf32>
    tpu.vector_store %arg5[%c0_8, %c0_9], %24 {strides = array<i32>} : memref<16x32xf32, #tpu.memory_space<vmem>>, vector<16x32xf32>,
    return
  }
  func.func @transform_0(%arg0: i32) -> (i32, i32) {
    %c0_i32 = arith.constant 0 : i32
    %c0_i32_0 = arith.constant 0 : i32
    return %arg0, %c0_i32 : i32, i32
  }
  func.func @transform_1(%arg0: i32) -> (i32, i32) {
    %c0_i32 = arith.constant 0 : i32
    %c0_i32_0 = arith.constant 0 : i32
    return %arg0, %c0_i32 : i32, i32
  }
  func.func @transform_2(%arg0: i32) -> (i32, i32) {
    %c0_i32 = arith.constant 0 : i32
    %c0_i32_0 = arith.constant 0 : i32
    %c0_i32_1 = arith.constant 0 : i32
    return %c0_i32, %c0_i32_0 : i32, i32
  }
  func.func @transform_3(%arg0: i32) -> (i32, i32) {
    %c0_i32 = arith.constant 0 : i32
    %c0_i32_0 = arith.constant 0 : i32
    %c0_i32_1 = arith.constant 0 : i32
    return %c0_i32, %c0_i32_0 : i32, i32
  }
  func.func @transform_4(%arg0: i32) -> (i32, i32) {
    %c0_i32 = arith.constant 0 : i32
    %c0_i32_0 = arith.constant 0 : i32
    return %arg0, %c0_i32 : i32, i32
  }
}

</mosaic_0001>

<bundles_post_ra>
// kernel: tpu_custom_call.1
= control target key start
LH: loop header
LB: loop body
LE: loop exit
PB: predicated region body
PF: predicated region fallthrough
CT: control target
= control target key end

     0   :  { %v387_v2 = vmov 0   ;;  %s481_s0 = inlined_call_operand.vmem [shape: f32[16,12], index: 0, kind: input, shape index: {}]   ;;  %s482_s1 = inlined_call_operand.vmem [shape: s32[16,4], index: 1, kind: input, shape index: {}]   ;;  %s483_s2 = inlined_call_operand.vmem [shape: f32[12,32], index: 2, kind: input, shape index: {}]   ;;  %s484_s3 = inlined_call_operand.vmem [shape: f32[80,32], index: 3, kind: input, shape index: {}]   ;;  %s485_s4 = inlined_call_operand.hbm [shape: f32[16,32], index: 4, kind: output, shape index: {}]  }
   0x1   :  { %v23_v0 = vld [vmem:[%s482_s1 + $0x8] sm:$0xff]  ;;  %v22_v1 = vld [vmem:[%s482_s1] sm:$0xff]  ;;  %357 = vset.pattern.permute.xlu1 %v387_v2  ;;  %355 = vset.pattern.permute.xlu0 %v387_v2 }
   0x2   :  { %v68_v3 = vld [vmem:[%s484_s3] sm:$0xff]  ;;  %v69_v4 = vld [vmem:[%s484_s3 + $0x8] sm:$0xff] }
   0x3   :  { %9 = vsyncpa [#allocation3], 0  ;;  %30 = vperm.xlu1 %357, %v23_v0   ;;  %27 = vperm.xlu0 %355, %v22_v1   ;;  %v318_v5 = vpack.c.bf16 %v69_v4, %v68_v3  ;;  %v70_v6 = vld [vmem:[%s484_s3 + $0x10] sm:$0xff]  ;;  %v71_v7 = vld [vmem:[%s484_s3 + $0x18] sm:$0xff]  ;;  %v388_v8 = vmov 1   ;;  %v389_v12 = vmov 2   ;;  %v24_v28 = vlaneseq }
   0x4   :  { %v322_v9 = vpack.c.bf16 %v71_v7, %v70_v6  ;;  %v72_v10 = vld [vmem:[%s484_s3 + $0x20] sm:$0xff]  ;;  %v73_v11 = vld [vmem:[%s484_s3 + $0x28] sm:$0xff]  ;;  %v74_v14 = vld [vmem:[%s484_s3 + $0x30] sm:$0xff]  ;;  %v390_v17 = vmov 3   ;;  %vm167_vm0 = vcmask 1043456   ;;  %vm391_vm1 = vmmov 1  }
   0x5   :  { %319 = vmatprep.subr.bf16.mxu1 %v318_v5  ;;  %v326_v13 = vpack.c.bf16 %v73_v11, %v72_v10  ;;  %v75_v15 = vld [vmem:[%s484_s3 + $0x38] sm:$0xff]  ;;  %v20_v18 = vld [vmem:[%s483_s2] sm:$0xff]  ;;  %v21_v19 = vld [vmem:[%s483_s2 + $0x8] sm:$0xf]  ;;  %vm160_vm3 = vcmask 97280   ;;  %v25_v30 = vand.u32 127, %v24_v28 }
   0x6   :  { %321 = vmatpush3.bf16.msra.mxu1 %v318_v5  ;;  %v330_v16 = vpack.c.bf16 %v75_v15, %v74_v14  ;;  %v76_v20 = vld [vmem:[%s484_s3 + $0x40] sm:$0xff]  ;;  %v338_v21 = vpack.c.bf16 %v21_v19, %v20_v18  ;;  %vm339_vm2 = vmpackc.low %vm167_vm0, %vm391_vm1  ;;  %v77_v22 = vld [vmem:[%s484_s3 + $0x48] sm:$0xff]  ;;  %vm78_vm11 = vcmask 654336   ;;  %v392_v35 = vmov 0.0  }
   0x7   :  { %358 = vset.pattern.permute.xlu1 %v388_v8  ;;  %356 = vset.pattern.permute.xlu0 %v388_v8  ;;  %v334_v23 = vpack.c.bf16 %v77_v22, %v76_v20  ;;  %v18_v24 = vld [vmem:[%s481_s0] sm:$0xff]  ;;  %v19_v25 = vld [vmem:[%s481_s0 + $0x8] sm:$0xff]  ;;  %s393_s0 = smov [#allocation2]  }
   0x8   :  { %38 = vperm.xlu1 %358, %v23_v0   ;;  %35 = vperm.xlu0 %356, %v22_v1   ;;  %s254_s3 = sshll.u32 %s393_s0, 4  ;;  %s255_s3 = int_to_ptr.vmem [resolvable:$true] %s254_s3 }
   0x9   :  { %323 = vmatprep.subr.bf16.mxu1 %v322_v9  ;;  %340 = vmatprep.subr.msk.bf16.mxu0 %vm339_vm2, %v338_v21  ;;  %s363_s19 = scalar_lea.vmem %s255_s3, 256  ;;  %p368_p1 = scmp.lt.s32.totalorder %s255_s3, %s255_s3 }
   0xa   :  { %325 = vmatpush3.bf16.msra.mxu1 %v322_v9  ;;  %343 = vmatpush3.bf16.msk.msra.mxu0 %vm339_vm2, %v338_v21  ;;  %p364_p0 = scmp.ne.s32.totalorder %s255_s3, %s363_s19  ;;  %p369_p2 = scmp.lt.s32.totalorder %s363_s19, %s363_s19 }
   0xb   :  { %327 = vmatprep.subr.bf16.mxu1 %v326_v13  ;;  %315 = vmatprep.mubr.msk.f32.mxu0 %vm160_vm3, %v18_v24 }
   0xc   :  { %359 = vset.pattern.permute.xlu1 %v389_v12  ;;  %360 = vset.pattern.permute.xlu0 %v389_v12  ;;  %p370_p3 = por %p369_p2, %p368_p1 }
   0xd   :  { %45 = vperm.xlu1 %359, %v22_v1   ;;  %48 = vperm.xlu0 %360, %v23_v0  }
   0xe   :  { %329 = vmatpush3.bf16.msra.mxu1 %v326_v13  ;;  %316 = vmatmul.mubr.msk.f32.vlgmr.msra.gmra.mrb[0].mxu0 %vm160_vm3, %v19_v25  ;;  %vm246_vm3 = vcmask 261120   ;;  %p371_p4 = pnand %p370_p3, %p364_p0 }
   0xf   :  { %331 = vmatprep.subr.bf16.mxu1 %v330_v16 }
  0x11   :  { %361 = vset.pattern.permute.xlu1 %v390_v17  ;;  %362 = vset.pattern.permute.xlu0 %v390_v17 }
  0x12   :  { %55 = vperm.xlu1 %361, %v22_v1   ;;  %333 = vmatpush3.bf16.msra.mxu1 %v330_v16 }
  0x13   :  { %335 = vmatprep.subr.bf16.mxu1 %v334_v23 }
  0x16   :  { %58 = vperm.xlu1 %361, %v23_v0   ;;  %337 = vmatpush3.bf16.msra.mxu1 %v334_v23 }
  0x82   :  { %v31_v26 = vpop.permute.xlu1 %30  ;;  %v28_v27 = vpop.permute.xlu0 %27 }
  0x83   :  { %vm32_vm4 = vcmp.eq.s32.totalorder %v25_v30, %v28_v27  ;;  %vm33_vm14 = vcmp.eq.s32.totalorder %v25_v30, %v31_v26 }
  0x87   :  { %v39_v29 = vpop.permute.xlu1 %38  ;;  %v36_v31 = vpop.permute.xlu0 %35 }
  0x88   :  { %vm40_vm5 = vcmp.eq.s32.totalorder %v25_v30, %v36_v31  ;;  %vm41_vm8 = vcmp.eq.s32.totalorder %v25_v30, %v39_v29 }
  0x89   :  { %vm42_vm6 = vmor %vm32_vm4, %vm40_vm5 }
  0x8a   :  { %vm43_vm15 = vmor %vm33_vm14, %vm41_vm8 }
  0x8c   :  { %v46_v32 = vpop.permute.xlu1 %45  ;;  %v49_v33 = vpop.permute.xlu0 %48 }
  0x8d   :  { %vm50_vm7 = vcmp.eq.s32.totalorder %v25_v30, %v46_v32  ;;  %vm51_vm12 = vcmp.eq.s32.totalorder %v25_v30, %v49_v33 }
  0x8e   :  { %vm52_vm9 = vmor %vm42_vm6, %vm50_vm7 }
  0x8f   :  { %vm53_vm0 = vmor %vm43_vm15, %vm51_vm12 }
  0x91   :  { %v56_v34 = vpop.permute.xlu1 %55 }
  0x92   :  { %vm60_vm10 = vcmp.eq.s32.totalorder %v25_v30, %v56_v34 }
  0x93   :  { %vm62_vm13 = vmor %vm52_vm9, %vm60_vm10 }
  0x94   :  { %v265_v36 = vsel %vm62_vm13, 1.0, %v392_v35 }
  0x95   :  { %v59_v37 = vpop.permute.xlu1 %58  ;;  %308 = vmatprep.mubr.msk.f32.mxu1 %vm78_vm11, %v265_v36 }
  0x96   :  { %vm61_vm1 = vcmp.eq.s32.totalorder %v25_v30, %v59_v37 }
  0x97   :  { %vm63_vm2 = vmor %vm53_vm0, %vm61_vm1 }
  0x98   :  { %v266_v38 = vsel %vm63_vm2, 1.0, %v392_v35 }
  0x99   :  { %309 = vmatmul.mubr.msk.f32.vlgmr.msra.gmra.mrb[0].mxu1 %vm78_vm11, %v266_v38 }
  0xe1   :  { %v317_v39 = vpop.f32.mrb[0].mxu0 }
  0xe2   :  { %v237_v40 = vpop.f32.mrb[1].mxu0 }
 0x16c   :  { %v310_v41 = vpop.f32.mrb[0].mxu1 }
 0x16d   :  { %v243_v42 = vadd.f32 %v317_v39, %v310_v41  ;;  %v151_v43 = vpop.f32.mrb[1].mxu1 }
 0x16e   :  { %v238_v44 = vadd.f32 %v237_v40, %v151_v43 }
 0x16f   :  { %248 = vst.msk [vmem:[#allocation2 + $0x8] sm:$0xff] %vm246_vm3, %v243_v42 }
 0x170   :  { %247 = vst.msk [vmem:[#allocation2] sm:$0xff] %vm246_vm3, %v238_v44 }
 0x171   :  { %374 = shalt.err (!%p371_p4)
}
 0x172   :  { %s375_s22 = scalar_lea.hbm %s485_s4, 256 }
 0x173   :  { %p376_p5 = scmp.ne.s32.totalorder %s485_s4, %s375_s22  ;;  %p379_p6 = scmp.lt.u32.totalorder %s375_s22, %s485_s4 }
 0x175   :  { %p381_p7 = pnand %p379_p6, %p376_p5 }
 0x177   :  { %384 = shalt.err (!%p381_p7)
}
 0x178   :  { %s394_s26 = smov 128   ;;  %s395_s27 = smov 8  }
 0x179   :  { %260 = dma.vmem_to_hbm [thread:$0]  %s255_s3, 256, %s485_s4, [#allocation3], %s394_s26, %s394_s26, %s395_s27  }
 0x17a   :  { %385 = dma.done.wait [#allocation3], 256  }
 0x17b   :  { %386 = vsyncadd [#allocation3], 4294967040 }
 0x17c   :  { %264 = vsyncpa [#allocation3], 1 }

</bundles_post_ra>
